<compile_context>
chip_gen: v7x
topology: tpu7x:2x2x1
jax: 0.10.0
libtpu: 0.0.40
codegen_flags: <defaults>
</compile_context>

<pallas_src>
import functools
import math

import jax
import jax.numpy as jnp
from jax.experimental import pallas as pl
from jax.experimental.pallas import tpu as pltpu

LN_EPS = 1e-12                       # BERT layer-norm epsilon
VMEM_LIMIT = 48 * 1024 * 1024        # stays under v7x's 64 MiB physical VMEM
TOKEN_TILE_TARGET = 256              # token-tile rows at real BERT sizes


# ------------------------------ small helpers --------------------------------

def _choose_tile(n, target=TOKEN_TILE_TARGET):
    """Largest power-of-two tile <= target that divides n (else the full dim)."""
    t = target
    while t >= 8:
        if n % t == 0:
            return t
        t //= 2
    return n


def _cparams(n_axes):
    return pltpu.CompilerParams(
        dimension_semantics=("parallel",) * n_axes,
        vmem_limit_bytes=VMEM_LIMIT)


def _layernorm(x, gamma, beta):
    # f32 in, f32 out
    mu = jnp.mean(x, axis=-1, keepdims=True)
    var = jnp.mean((x - mu) ** 2, axis=-1, keepdims=True)
    return (x - mu) * jax.lax.rsqrt(var + LN_EPS) * gamma + beta


def _gelu(x):
    # tanh approximation of GELU (BERT uses exact erf-GELU; differs by <1e-3)
    return 0.5 * x * (1.0 + jnp.tanh(0.7978845608028654 * (x + 0.044715 * x ** 3)))


# --------------------------------- kernels -----------------------------------

def embed_ln_kernel(w_ref, t_ref, p_ref, g_ref, b_ref, o_ref):
    # word + position + token-type embeddings (bf16 in), LayerNorm in f32
    x = (w_ref[0].astype(jnp.float32) + t_ref[0].astype(jnp.float32)
         + p_ref[...].astype(jnp.float32))
    o_ref[0] = _layernorm(x, g_ref[...], b_ref[...]).astype(o_ref.dtype)


def qkv_kernel(x_ref, w_ref, b_ref, q_ref, k_ref, v_ref):
    # one fused [TM, H] @ [H, 3H] matmul on the MXU, f32 accumulation
    qkv = (jnp.dot(x_ref[...], w_ref[...], preferred_element_type=jnp.float32)
           + b_ref[...])
    qkv = qkv.astype(q_ref.dtype)
    H = q_ref.shape[-1]
    q_ref[...] = qkv[:, :H]
    k_ref[...] = qkv[:, H:2 * H]
    v_ref[...] = qkv[:, 2 * H:]


def attention_kernel(q_ref, k_ref, v_ref, bias_ref, o_ref, *, scale):
    # q: (1, nh, TQ, dh), k/v: (1, nh, S, dh), bias: (1, 1, S)
    q = q_ref[0]
    k = k_ref[0]
    v = v_ref[0]
    # one dot_general batched over heads (leading batch dim), f32 scores
    s = jnp.einsum('hqd,hkd->hqk', q, k,
                   preferred_element_type=jnp.float32) * scale
    s = s + bias_ref[...]                       # additive attention mask
    s = s - jnp.max(s, axis=-1, keepdims=True)
    p = jnp.exp(s)
    inv = pl.reciprocal(jnp.sum(p, axis=-1, keepdims=True), approx=True)
    p = (p * inv).astype(v.dtype)
    ctx = jnp.einsum('hqk,hkd->hqd', p, v,
                     preferred_element_type=jnp.float32)
    o_ref[0] = ctx.astype(o_ref.dtype)


def post_attn_kernel(ctx_ref, x_ref,
                     wo_ref, bo_ref, ln1g_ref, ln1b_ref,
                     w1_ref, b1_ref, w2_ref, b2_ref, ln2g_ref, ln2b_ref,
                     o_ref):
    # attention output projection + residual + LN1 + FFN + residual + LN2,
    # all on one token tile; matmul inputs bf16, everything else f32.
    x = x_ref[...].astype(jnp.float32)
    attn = (jnp.dot(ctx_ref[...], wo_ref[...],
                    preferred_element_type=jnp.float32) + bo_ref[...])
    x1 = _layernorm(attn + x, ln1g_ref[...], ln1b_ref[...])
    h1 = (jnp.dot(x1.astype(w1_ref.dtype), w1_ref[...],
                  preferred_element_type=jnp.float32) + b1_ref[...])
    h1 = _gelu(h1)
    ffn = (jnp.dot(h1.astype(w2_ref.dtype), w2_ref[...],
                   preferred_element_type=jnp.float32) + b2_ref[...])
    o_ref[...] = _layernorm(ffn + x1, ln2g_ref[...], ln2b_ref[...]).astype(o_ref.dtype)


# --------------------------------- wrappers ----------------------------------

def embed_layernorm(wemb, temb, pemb, gamma, beta):
    B, S, H = wemb.shape
    TS = _choose_tile(S)
    grid = (B, S // TS)
    return pl.pallas_call(
        embed_ln_kernel,
        out_shape=jax.ShapeDtypeStruct((B, S, H), wemb.dtype),
        grid=grid,
        in_specs=[
            pl.BlockSpec((1, TS, H), lambda b, s: (b, s, 0)),
            pl.BlockSpec((1, TS, H), lambda b, s: (b, s, 0)),
            pl.BlockSpec((TS, H), lambda b, s: (s, 0)),
            pl.BlockSpec((1, H), lambda b, s: (0, 0)),
            pl.BlockSpec((1, H), lambda b, s: (0, 0)),
        ],
        out_specs=pl.BlockSpec((1, TS, H), lambda b, s: (b, s, 0)),
        compiler_params=_cparams(2),
    )(wemb, temb, pemb, gamma, beta)


def qkv_proj(x, wqkv, bqkv):
    NT, H = x.shape
    TM = _choose_tile(NT)
    grid = (NT // TM,)
    out = jax.ShapeDtypeStruct((NT, H), x.dtype)
    return pl.pallas_call(
        qkv_kernel,
        out_shape=(out, out, out),
        grid=grid,
        in_specs=[
            pl.BlockSpec((TM, H), lambda i: (i, 0)),
            pl.BlockSpec(wqkv.shape, lambda i: (0, 0)),   # weights: DMA'd once
            pl.BlockSpec(bqkv.shape, lambda i: (0, 0)),
        ],
        out_specs=(
            pl.BlockSpec((TM, H), lambda i: (i, 0)),
            pl.BlockSpec((TM, H), lambda i: (i, 0)),
            pl.BlockSpec((TM, H), lambda i: (i, 0)),
        ),
        compiler_params=_cparams(1),
    )(x, wqkv, bqkv)


def attention(q, k, v, mask_bias):
    B, NH, S, DH = q.shape
    TQ = _choose_tile(S)
    grid = (B, S // TQ)
    kernel = functools.partial(attention_kernel, scale=1.0 / math.sqrt(DH))
    return pl.pallas_call(
        kernel,
        out_shape=jax.ShapeDtypeStruct((B, NH, S, DH), q.dtype),
        grid=grid,
        in_specs=[
            pl.BlockSpec((1, NH, TQ, DH), lambda b, qi: (b, 0, qi, 0)),
            pl.BlockSpec((1, NH, S, DH), lambda b, qi: (b, 0, 0, 0)),
            pl.BlockSpec((1, NH, S, DH), lambda b, qi: (b, 0, 0, 0)),
            pl.BlockSpec((1, 1, S), lambda b, qi: (b, 0, 0)),
        ],
        out_specs=pl.BlockSpec((1, NH, TQ, DH), lambda b, qi: (b, 0, qi, 0)),
        compiler_params=_cparams(2),
    )(q, k, v, mask_bias)


def post_attn(ctx, x, lp):
    NT, H = x.shape
    TM = _choose_tile(NT)
    grid = (NT // TM,)

    def full(a):
        nd = a.ndim
        return pl.BlockSpec(a.shape, lambda i, _nd=nd: (0,) * _nd)

    args = (ctx, x, lp['wo'], lp['bo'], lp['ln1_g'], lp['ln1_b'],
            lp['w1'], lp['b1'], lp['w2'], lp['b2'], lp['ln2_g'], lp['ln2_b'])
    in_specs = ([pl.BlockSpec((TM, H), lambda i: (i, 0)),
                 pl.BlockSpec((TM, H), lambda i: (i, 0))]
                + [full(a) for a in args[2:]])
    return pl.pallas_call(
        post_attn_kernel,
        out_shape=jax.ShapeDtypeStruct((NT, H), x.dtype),
        grid=grid,
        in_specs=in_specs,
        out_specs=pl.BlockSpec((TM, H), lambda i: (i, 0)),
        input_output_aliases={1: 0},        # write new hidden state over x
        compiler_params=_cparams(1),
    )(*args)


# TODO(synk): cross-pallas_call prefetch of the next layer's weights (P10) could
# hide the per-layer weight DMA behind the previous layer's compute.
@functools.partial(jax.jit, static_argnames=('num_heads',))
def etri_kobert_forward(params, input_ids, segs, mask, *, num_heads):
    """Equivalent of ETRI_KOBERT.forward: returns top_vec = last hidden states."""
    B, S = input_ids.shape
    H = params['word_emb'].shape[-1]
    dh = H // num_heads

    # embedding lookups are pure gathers (glue) -> plain JAX
    wemb = jnp.take(params['word_emb'], input_ids, axis=0)      # [B,S,H] bf16
    temb = jnp.take(params['type_emb'], segs, axis=0)           # [B,S,H] bf16
    pemb = params['pos_emb'][:S]                                # [S,H]   bf16

    h = embed_layernorm(wemb, temb, pemb,
                        params['emb_ln_g'], params['emb_ln_b'])
    h = h.reshape(B * S, H)                                     # flat token-major

    mask_bias = ((1.0 - mask.astype(jnp.float32)) * -10000.0)[:, None, :]  # [B,1,S]

    def to_heads(t):        # [B*S, H] -> [B, nh, S, dh]  (layout plumbing, once/tensor)
        return t.reshape(B, S, num_heads, dh).transpose(0, 2, 1, 3)

    for lp in params['layers']:
        q, k, v = qkv_proj(h, lp['wqkv'], lp['bqkv'])
        ctx = attention(to_heads(q), to_heads(k), to_heads(v), mask_bias)
        ctx = ctx.transpose(0, 2, 1, 3).reshape(B * S, H)
        h = post_attn(ctx, h, lp)

    return h.reshape(B, S, H).astype(jnp.float32)


# ------------------------------ parameter init --------------------------------

def init_params(key, *, vocab, hidden, n_layers, n_heads, intermediate,
                max_pos, type_vocab):
    std = 0.02
    keys = jax.random.split(key, 4 + n_layers)

    def nrm(k, shape, dtype=jnp.bfloat16):
        return (jax.random.normal(k, shape, jnp.float32) * std).astype(dtype)

    params = {
        'word_emb': nrm(keys[0], (vocab, hidden)),
        'pos_emb': nrm(keys[1], (max_pos, hidden)),
        'type_emb': nrm(keys[2], (type_vocab, hidden)),
        'emb_ln_g': jnp.ones((1, hidden), jnp.float32),
        'emb_ln_b': jnp.zeros((1, hidden), jnp.float32),
        # li1 = nn.Linear(768, d_model): declared in __init__, unused in forward.
        'li1_w': nrm(keys[3], (768, hidden), jnp.float32),
        'li1_b': jnp.zeros((1, hidden), jnp.float32),
        'layers': [],
    }
    for li in range(n_layers):
        ks = jax.random.split(keys[4 + li], 6)
        wq = nrm(ks[0], (hidden, hidden))
        wk = nrm(ks[1], (hidden, hidden))
        wv = nrm(ks[2], (hidden, hidden))
        params['layers'].append({
            # fused QKV weight: one [H, 3H] matmul per token tile
            'wqkv': jnp.concatenate([wq, wk, wv], axis=1),
            'bqkv': jnp.zeros((1, 3 * hidden), jnp.float32),
            'wo': nrm(ks[3], (hidden, hidden)),
            'bo': jnp.zeros((1, hidden), jnp.float32),
            'ln1_g': jnp.ones((1, hidden), jnp.float32),
            'ln1_b': jnp.zeros((1, hidden), jnp.float32),
            'w1': nrm(ks[4], (hidden, intermediate)),
            'b1': jnp.zeros((1, intermediate), jnp.float32),
            'w2': nrm(ks[5], (intermediate, hidden)),
            'b2': jnp.zeros((1, hidden), jnp.float32),
            'ln2_g': jnp.ones((1, hidden), jnp.float32),
            'ln2_b': jnp.zeros((1, hidden), jnp.float32),
        })
    return params


# ----------------------------------- main -------------------------------------

if __name__ == "__main__":
    # small synthetic BERT config (real deployments should keep H a multiple of
    # 128 and dh >= 64 so lane utilization / vst stores are dense).
    VOCAB, HIDDEN, LAYERS, HEADS, INTER, MAX_POS, TYPES = 100, 32, 2, 4, 64, 64, 2
    B, S = 2, 8

    key = jax.random.PRNGKey(0)
    pkey, ikey, skey = jax.random.split(key, 3)
    params = init_params(pkey, vocab=VOCAB, hidden=HIDDEN, n_layers=LAYERS,
                         n_heads=HEADS, intermediate=INTER, max_pos=MAX_POS,
                         type_vocab=TYPES)

    input_ids = jax.random.randint(ikey, (B, S), 0, VOCAB, dtype=jnp.int32)
    segs = jax.random.randint(skey, (B, S), 0, TYPES, dtype=jnp.int32)
    mask = jnp.ones((B, S), jnp.int32).at[1, S - 2:].set(0)   # pad last 2 of row 1

    top_vec = etri_kobert_forward(params, input_ids, segs, mask, num_heads=HEADS)
    top_vec = jax.block_until_ready(top_vec)

    assert top_vec.shape == (B, S, HIDDEN)
    assert bool(jnp.all(jnp.isfinite(top_vec)))
    print("KERNEL_OK")
</pallas_src>

<mosaic_0001>
module attributes {stable_mosaic.version = 11 : i64} {
  func.func @qkv_kernel(%arg0: i32, %arg1: memref<16x32xbf16, #tpu.memory_space<vmem>>, %arg2: memref<32x96xbf16, #tpu.memory_space<vmem>>, %arg3: memref<1x96xf32, #tpu.memory_space<vmem>>, %arg4: memref<16x32xbf16, #tpu.memory_space<vmem>>, %arg5: memref<16x32xbf16, #tpu.memory_space<vmem>>, %arg6: memref<16x32xbf16, #tpu.memory_space<vmem>>) attributes {dimension_semantics = [#tpu.dimension_semantics<parallel>], iteration_bounds = array<i64: 1>, scalar_prefetch = 0 : i64, scratch_operands = 0 : i64, tpu.core_type = #tpu.core_type<tc>, window_params = [{transform_indices = @transform_0, window_bounds = array<i64: 16, 32>}, {pipeline_mode = #tpu.pipeline_mode<synchronous>, transform_indices = @transform_1, window_bounds = array<i64: 32, 96>}, {pipeline_mode = #tpu.pipeline_mode<synchronous>, transform_indices = @transform_2, window_bounds = array<i64: 1, 96>}, {transform_indices = @transform_3, window_bounds = array<i64: 16, 32>}, {transform_indices = @transform_4, window_bounds = array<i64: 16, 32>}, {transform_indices = @transform_5, window_bounds = array<i64: 16, 32>}]} {
    %c0 = arith.constant 0 : index
    %c0_0 = arith.constant 0 : index
    %0 = vector.load %arg1[%c0, %c0_0] : memref<16x32xbf16, #tpu.memory_space<vmem>>, vector<16x32xbf16>
    %c0_1 = arith.constant 0 : index
    %c0_2 = arith.constant 0 : index
    %1 = vector.load %arg2[%c0_1, %c0_2] : memref<32x96xbf16, #tpu.memory_space<vmem>>, vector<32x96xbf16>
    %cst = arith.constant dense<0.000000e+00> : vector<16x96xf32>
    %2 = tpu.matmul %0, %1, %cst {dimension_numbers = #tpu.dot_dimension_numbers<[1], [0], [0], [1], [0, 0, 1, 1], [], []>} : vector<16x32xbf16>, vector<32x96xbf16>, vector<16x96xf32> -> vector<16x96xf32>
    %c0_3 = arith.constant 0 : index
    %c0_4 = arith.constant 0 : index
    %3 = vector.load %arg3[%c0_3, %c0_4] : memref<1x96xf32, #tpu.memory_space<vmem>>, vector<1x96xf32>
    %4 = vector.broadcast %3 : vector<1x96xf32> to vector<16x96xf32>
    %5 = arith.addf %2, %4 : vector<16x96xf32>
    %6 = arith.truncf %5 : vector<16x96xf32> to vector<16x96xbf16>
    %7 = vector.extract_strided_slice %6 {offsets = [0, 0], sizes = [16, 32], strides = [1, 1]} : vector<16x96xbf16> to vector<16x32xbf16>
    %c0_5 = arith.constant 0 : index
    %c0_6 = arith.constant 0 : index
    %8 = vector.load %arg4[%c0_5, %c0_6] : memref<16x32xbf16, #tpu.memory_space<vmem>>, vector<16x32xbf16>
    tpu.vector_store %arg4[%c0_5, %c0_6], %7 {strides = array<i32>} : memref<16x32xbf16, #tpu.memory_space<vmem>>, vector<16x32xbf16>,
    %9 = vector.extract_strided_slice %6 {offsets = [0, 32], sizes = [16, 32], strides = [1, 1]} : vector<16x96xbf16> to vector<16x32xbf16>
    %c0_7 = arith.constant 0 : index
    %c0_8 = arith.constant 0 : index
    %10 = vector.load %arg5[%c0_7, %c0_8] : memref<16x32xbf16, #tpu.memory_space<vmem>>, vector<16x32xbf16>
    tpu.vector_store %arg5[%c0_7, %c0_8], %9 {strides = array<i32>} : memref<16x32xbf16, #tpu.memory_space<vmem>>, vector<16x32xbf16>,
    %11 = vector.extract_strided_slice %6 {offsets = [0, 64], sizes = [16, 32], strides = [1, 1]} : vector<16x96xbf16> to vector<16x32xbf16>
    %c0_9 = arith.constant 0 : index
    %c0_10 = arith.constant 0 : index
    %12 = vector.load %arg6[%c0_9, %c0_10] : memref<16x32xbf16, #tpu.memory_space<vmem>>, vector<16x32xbf16>
    tpu.vector_store %arg6[%c0_9, %c0_10], %11 {strides = array<i32>} : memref<16x32xbf16, #tpu.memory_space<vmem>>, vector<16x32xbf16>,
    return
  }
  func.func @transform_0(%arg0: i32) -> (i32, i32) {
    %c0_i32 = arith.constant 0 : i32
    %c0_i32_0 = arith.constant 0 : i32
    return %arg0, %c0_i32 : i32, i32
  }
  func.func @transform_1(%arg0: i32) -> (i32, i32) {
    %c0_i32 = arith.constant 0 : i32
    %c0_i32_0 = arith.constant 0 : i32
    %c0_i32_1 = arith.constant 0 : i32
    return %c0_i32, %c0_i32_0 : i32, i32
  }
  func.func @transform_2(%arg0: i32) -> (i32, i32) {
    %c0_i32 = arith.constant 0 : i32
    %c0_i32_0 = arith.constant 0 : i32
    %c0_i32_1 = arith.constant 0 : i32
    return %c0_i32, %c0_i32_0 : i32, i32
  }
  func.func @transform_3(%arg0: i32) -> (i32, i32) {
    %c0_i32 = arith.constant 0 : i32
    %c0_i32_0 = arith.constant 0 : i32
    return %arg0, %c0_i32 : i32, i32
  }
  func.func @transform_4(%arg0: i32) -> (i32, i32) {
    %c0_i32 = arith.constant 0 : i32
    %c0_i32_0 = arith.constant 0 : i32
    return %arg0, %c0_i32 : i32, i32
  }
  func.func @transform_5(%arg0: i32) -> (i32, i32) {
    %c0_i32 = arith.constant 0 : i32
    %c0_i32_0 = arith.constant 0 : i32
    return %arg0, %c0_i32 : i32, i32
  }
}

module attributes {stable_mosaic.version = 11 : i64} {
  func.func @embed_ln_kernel(%arg0: i32, %arg1: i32, %arg2: memref<1x8x32xbf16, #tpu.memory_space<vmem>>, %arg3: memref<1x8x32xbf16, #tpu.memory_space<vmem>>, %arg4: memref<8x32xbf16, #tpu.memory_space<vmem>>, %arg5: memref<1x32xf32, #tpu.memory_space<vmem>>, %arg6: memref<1x32xf32, #tpu.memory_space<vmem>>, %arg7: memref<1x8x32xbf16, #tpu.memory_space<vmem>>) attributes {dimension_semantics = [#tpu.dimension_semantics<parallel>, #tpu.dimension_semantics<parallel>], iteration_bounds = array<i64: 2, 1>, scalar_prefetch = 0 : i64, scratch_operands = 0 : i64, tpu.core_type = #tpu.core_type<tc>, window_params = [{transform_indices = @transform_0, window_bounds = array<i64: 1, 8, 32>}, {transform_indices = @transform_1, window_bounds = array<i64: 1, 8, 32>}, {transform_indices = @transform_2, window_bounds = array<i64: 8, 32>}, {pipeline_mode = #tpu.pipeline_mode<synchronous>, transform_indices = @transform_3, window_bounds = array<i64: 1, 32>}, {pipeline_mode = #tpu.pipeline_mode<synchronous>, transform_indices = @transform_4, window_bounds = array<i64: 1, 32>}, {transform_indices = @transform_5, window_bounds = array<i64: 1, 8, 32>}]} {
    %c0 = arith.constant 0 : index
    %c0_0 = arith.constant 0 : index
    %c0_1 = arith.constant 0 : index
    %0 = vector.load %arg2[%c0, %c0_0, %c0_1] : memref<1x8x32xbf16, #tpu.memory_space<vmem>>, vector<1x8x32xbf16>
    %1 = vector.shape_cast %0 : vector<1x8x32xbf16> to vector<8x32xbf16>
    %2 = arith.extf %1 : vector<8x32xbf16> to vector<8x32xf32>
    %c0_2 = arith.constant 0 : index
    %c0_3 = arith.constant 0 : index
    %c0_4 = arith.constant 0 : index
    %3 = vector.load %arg3[%c0_2, %c0_3, %c0_4] : memref<1x8x32xbf16, #tpu.memory_space<vmem>>, vector<1x8x32xbf16>
    %4 = vector.shape_cast %3 : vector<1x8x32xbf16> to vector<8x32xbf16>
    %5 = arith.extf %4 : vector<8x32xbf16> to vector<8x32xf32>
    %6 = arith.addf %2, %5 : vector<8x32xf32>
    %c0_5 = arith.constant 0 : index
    %c0_6 = arith.constant 0 : index
    %7 = vector.load %arg4[%c0_5, %c0_6] : memref<8x32xbf16, #tpu.memory_space<vmem>>, vector<8x32xbf16>
    %8 = arith.extf %7 : vector<8x32xbf16> to vector<8x32xf32>
    %9 = arith.addf %6, %8 : vector<8x32xf32>
    %c0_7 = arith.constant 0 : index
    %c0_8 = arith.constant 0 : index
    %10 = vector.load %arg5[%c0_7, %c0_8] : memref<1x32xf32, #tpu.memory_space<vmem>>, vector<1x32xf32>
    %c0_9 = arith.constant 0 : index
    %c0_10 = arith.constant 0 : index
    %11 = vector.load %arg6[%c0_9, %c0_10] : memref<1x32xf32, #tpu.memory_space<vmem>>, vector<1x32xf32>
    %cst = arith.constant dense<0.000000e+00> : vector<8xf32>
    %12 = vector.multi_reduction <add>, %9, %cst [1] : vector<8x32xf32> to vector<8xf32>
    %13 = vector.shape_cast %12 : vector<8xf32> to vector<8x1xf32>
    %cst_11 = arith.constant 3.200000e+01 : f32
    %14 = vector.broadcast %cst_11 : f32 to vector<8x1xf32>
    %15 = arith.divf %13, %14 : vector<8x1xf32>
    %16 = vector.broadcast %15 : vector<8x1xf32> to vector<8x32xf32>
    %17 = arith.subf %9, %16 : vector<8x32xf32>
    %18 = arith.mulf %17, %17 : vector<8x32xf32>
    %cst_12 = arith.constant dense<0.000000e+00> : vector<8xf32>
    %19 = vector.multi_reduction <add>, %18, %cst_12 [1] : vector<8x32xf32> to vector<8xf32>
    %20 = vector.shape_cast %19 : vector<8xf32> to vector<8x1xf32>
    %cst_13 = arith.constant 3.200000e+01 : f32
    %21 = vector.broadcast %cst_13 : f32 to vector<8x1xf32>
    %22 = arith.divf %20, %21 : vector<8x1xf32>
    %23 = vector.broadcast %15 : vector<8x1xf32> to vector<8x32xf32>
    %24 = arith.subf %9, %23 : vector<8x32xf32>
    %cst_14 = arith.constant 9.99999996E-13 : f32
    %25 = vector.broadcast %cst_14 : f32 to vector<8x1xf32>
    %26 = arith.addf %22, %25 : vector<8x1xf32>
    %27 = math.rsqrt %26 : vector<8x1xf32>
    %28 = vector.broadcast %27 : vector<8x1xf32> to vector<8x32xf32>
    %29 = arith.mulf %24, %28 : vector<8x32xf32>
    %30 = vector.broadcast %10 : vector<1x32xf32> to vector<8x32xf32>
    %31 = arith.mulf %29, %30 : vector<8x32xf32>
    %32 = vector.broadcast %11 : vector<1x32xf32> to vector<8x32xf32>
    %33 = arith.addf %31, %32 : vector<8x32xf32>
    %34 = arith.truncf %33 : vector<8x32xf32> to vector<8x32xbf16>
    %c0_15 = arith.constant 0 : index
    %c0_16 = arith.constant 0 : index
    %c0_17 = arith.constant 0 : index
    %35 = vector.load %arg7[%c0_15, %c0_16, %c0_17] : memref<1x8x32xbf16, #tpu.memory_space<vmem>>, vector<1x8x32xbf16>
    %36 = vector.shape_cast %35 : vector<1x8x32xbf16> to vector<8x32xbf16>
    %37 = vector.shape_cast %34 : vector<8x32xbf16> to vector<1x8x32xbf16>
    tpu.vector_store %arg7[%c0_15, %c0_16, %c0_17], %37 {strides = array<i32>} : memref<1x8x32xbf16, #tpu.memory_space<vmem>>, vector<1x8x32xbf16>,
    return
  }
  func.func @transform_0(%arg0: i32, %arg1: i32) -> (i32, i32, i32) {
    %c0_i32 = arith.constant 0 : i32
    %c0_i32_0 = arith.constant 0 : i32
    return %arg0, %arg1, %c0_i32 : i32, i32, i32
  }
  func.func @transform_1(%arg0: i32, %arg1: i32) -> (i32, i32, i32) {
    %c0_i32 = arith.constant 0 : i32
    %c0_i32_0 = arith.constant 0 : i32
    return %arg0, %arg1, %c0_i32 : i32, i32, i32
  }
  func.func @transform_2(%arg0: i32, %arg1: i32) -> (i32, i32) {
    %c0_i32 = arith.constant 0 : i32
    %c0_i32_0 = arith.constant 0 : i32
    return %arg1, %c0_i32 : i32, i32
  }
  func.func @transform_3(%arg0: i32, %arg1: i32) -> (i32, i32) {
    %c0_i32 = arith.constant 0 : i32
    %c0_i32_0 = arith.constant 0 : i32
    %c0_i32_1 = arith.constant 0 : i32
    return %c0_i32, %c0_i32_0 : i32, i32
  }
  func.func @transform_4(%arg0: i32, %arg1: i32) -> (i32, i32) {
    %c0_i32 = arith.constant 0 : i32
    %c0_i32_0 = arith.constant 0 : i32
    %c0_i32_1 = arith.constant 0 : i32
    return %c0_i32, %c0_i32_0 : i32, i32
  }
  func.func @transform_5(%arg0: i32, %arg1: i32) -> (i32, i32, i32) {
    %c0_i32 = arith.constant 0 : i32
    %c0_i32_0 = arith.constant 0 : i32
    return %arg0, %arg1, %c0_i32 : i32, i32, i32
  }
}

module attributes {stable_mosaic.version = 11 : i64} {
  func.func @attention_kernel(%arg0: i32, %arg1: i32, %arg2: memref<1x4x8x8xbf16, #tpu.memory_space<vmem>>, %arg3: memref<1x4x8x8xbf16, #tpu.memory_space<vmem>>, %arg4: memref<1x4x8x8xbf16, #tpu.memory_space<vmem>>, %arg5: memref<1x1x8xf32, #tpu.memory_space<vmem>>, %arg6: memref<1x4x8x8xbf16, #tpu.memory_space<vmem>>) attributes {dimension_semantics = [#tpu.dimension_semantics<parallel>, #tpu.dimension_semantics<parallel>], iteration_bounds = array<i64: 2, 1>, scalar_prefetch = 0 : i64, scratch_operands = 0 : i64, tpu.core_type = #tpu.core_type<tc>, window_params = [{transform_indices = @transform_0, window_bounds = array<i64: 1, 4, 8, 8>}, {transform_indices = @transform_1, window_bounds = array<i64: 1, 4, 8, 8>}, {transform_indices = @transform_2, window_bounds = array<i64: 1, 4, 8, 8>}, {transform_indices = @transform_3, window_bounds = array<i64: 1, 1, 8>}, {transform_indices = @transform_4, window_bounds = array<i64: 1, 4, 8, 8>}]} {
    %c0 = arith.constant 0 : index
    %c0_0 = arith.constant 0 : index
    %c0_1 = arith.constant 0 : index
    %c0_2 = arith.constant 0 : index
    %0 = vector.load %arg2[%c0, %c0_0, %c0_1, %c0_2] : memref<1x4x8x8xbf16, #tpu.memory_space<vmem>>, vector<1x4x8x8xbf16>
    %1 = vector.shape_cast %0 : vector<1x4x8x8xbf16> to vector<4x8x8xbf16>
    %c0_3 = arith.constant 0 : index
    %c0_4 = arith.constant 0 : index
    %c0_5 = arith.constant 0 : index
    %c0_6 = arith.constant 0 : index
    %2 = vector.load %arg3[%c0_3, %c0_4, %c0_5, %c0_6] : memref<1x4x8x8xbf16, #tpu.memory_space<vmem>>, vector<1x4x8x8xbf16>
    %3 = vector.shape_cast %2 : vector<1x4x8x8xbf16> to vector<4x8x8xbf16>
    %c0_7 = arith.constant 0 : index
    %c0_8 = arith.constant 0 : index
    %c0_9 = arith.constant 0 : index
    %c0_10 = arith.constant 0 : index
    %4 = vector.load %arg4[%c0_7, %c0_8, %c0_9, %c0_10] : memref<1x4x8x8xbf16, #tpu.memory_space<vmem>>, vector<1x4x8x8xbf16>
    %5 = vector.shape_cast %4 : vector<1x4x8x8xbf16> to vector<4x8x8xbf16>
    "tpu.trace_start"() <{level = 10 : i32, message = "hqd,hkd->hqk"}> : () -> ()
    %cst = arith.constant dense<0.000000e+00> : vector<4x8x8xf32>
    %6 = tpu.matmul %1, %3, %cst {dimension_numbers = #tpu.dot_dimension_numbers<[2], [2], [1], [1], [0, 0, 0, 1, 1, 1], [0], [0]>} : vector<4x8x8xbf16>, vector<4x8x8xbf16>, vector<4x8x8xf32> -> vector<4x8x8xf32>
    "tpu.trace_stop"() : () -> ()
    %cst_11 = arith.constant 0.353553385 : f32
    %7 = vector.broadcast %cst_11 : f32 to vector<4x8x8xf32>
    %8 = arith.mulf %6, %7 : vector<4x8x8xf32>
    %c0_12 = arith.constant 0 : index
    %c0_13 = arith.constant 0 : index
    %c0_14 = arith.constant 0 : index
    %9 = vector.load %arg5[%c0_12, %c0_13, %c0_14] : memref<1x1x8xf32, #tpu.memory_space<vmem>>, vector<1x1x8xf32>
    %10 = vector.broadcast %9 : vector<1x1x8xf32> to vector<4x8x8xf32>
    %11 = arith.addf %8, %10 : vector<4x8x8xf32>
    %cst_15 = arith.constant dense<0xFF800000> : vector<4x8xf32>
    %12 = vector.multi_reduction <maximumf>, %11, %cst_15 [2] : vector<4x8x8xf32> to vector<4x8xf32>
    %13 = vector.shape_cast %12 : vector<4x8xf32> to vector<4x8x1xf32>
    %14 = vector.broadcast %13 : vector<4x8x1xf32> to vector<4x8x8xf32>
    %15 = arith.subf %11, %14 : vector<4x8x8xf32>
    %16 = math.exp %15 : vector<4x8x8xf32>
    %cst_16 = arith.constant dense<0.000000e+00> : vector<4x8xf32>
    %17 = vector.multi_reduction <add>, %16, %cst_16 [2] : vector<4x8x8xf32> to vector<4x8xf32>
    %18 = vector.shape_cast %17 : vector<4x8xf32> to vector<4x8x1xf32>
    %19 = tpu.reciprocal %18 {approx = true} : vector<4x8x1xf32> -> vector<4x8x1xf32>
    %20 = vector.broadcast %19 : vector<4x8x1xf32> to vector<4x8x8xf32>
    %21 = arith.mulf %16, %20 : vector<4x8x8xf32>
    %22 = arith.truncf %21 : vector<4x8x8xf32> to vector<4x8x8xbf16>
    "tpu.trace_start"() <{level = 10 : i32, message = "hqk,hkd->hqd"}> : () -> ()
    %cst_17 = arith.constant dense<0.000000e+00> : vector<4x8x8xf32>
    %23 = tpu.matmul %22, %5, %cst_17 {dimension_numbers = #tpu.dot_dimension_numbers<[2], [1], [1], [2], [0, 0, 0, 1, 1, 2], [0], [0]>} : vector<4x8x8xbf16>, vector<4x8x8xbf16>, vector<4x8x8xf32> -> vector<4x8x8xf32>
    "tpu.trace_stop"() : () -> ()
    %24 = arith.truncf %23 : vector<4x8x8xf32> to vector<4x8x8xbf16>
    %c0_18 = arith.constant 0 : index
    %c0_19 = arith.constant 0 : index
    %c0_20 = arith.constant 0 : index
    %c0_21 = arith.constant 0 : index
    %25 = vector.load %arg6[%c0_18, %c0_19, %c0_20, %c0_21] : memref<1x4x8x8xbf16, #tpu.memory_space<vmem>>, vector<1x4x8x8xbf16>
    %26 = vector.shape_cast %25 : vector<1x4x8x8xbf16> to vector<4x8x8xbf16>
    %27 = vector.shape_cast %24 : vector<4x8x8xbf16> to vector<1x4x8x8xbf16>
    tpu.vector_store %arg6[%c0_18, %c0_19, %c0_20, %c0_21], %27 {strides = array<i32>} : memref<1x4x8x8xbf16, #tpu.memory_space<vmem>>, vector<1x4x8x8xbf16>,
    return
  }
  func.func @transform_0(%arg0: i32, %arg1: i32) -> (i32, i32, i32, i32) {
    %c0_i32 = arith.constant 0 : i32
    %c0_i32_0 = arith.constant 0 : i32
    %c0_i32_1 = arith.constant 0 : i32
    return %arg0, %c0_i32, %arg1, %c0_i32_0 : i32, i32, i32, i32
  }
  func.func @transform_1(%arg0: i32, %arg1: i32) -> (i32, i32, i32, i32) {
    %c0_i32 = arith.constant 0 : i32
    %c0_i32_0 = arith.constant 0 : i32
    %c0_i32_1 = arith.constant 0 : i32
    %c0_i32_2 = arith.constant 0 : i32
    return %arg0, %c0_i32, %c0_i32_0, %c0_i32_1 : i32, i32, i32, i32
  }
  func.func @transform_2(%arg0: i32, %arg1: i32) -> (i32, i32, i32, i32) {
    %c0_i32 = arith.constant 0 : i32
    %c0_i32_0 = arith.constant 0 : i32
    %c0_i32_1 = arith.constant 0 : i32
    %c0_i32_2 = arith.constant 0 : i32
    return %arg0, %c0_i32, %c0_i32_0, %c0_i32_1 : i32, i32, i32, i32
  }
  func.func @transform_3(%arg0: i32, %arg1: i32) -> (i32, i32, i32) {
    %c0_i32 = arith.constant 0 : i32
    %c0_i32_0 = arith.constant 0 : i32
    %c0_i32_1 = arith.constant 0 : i32
    return %arg0, %c0_i32, %c0_i32_0 : i32, i32, i32
  }
  func.func @transform_4(%arg0: i32, %arg1: i32) -> (i32, i32, i32, i32) {
    %c0_i32 = arith.constant 0 : i32
    %c0_i32_0 = arith.constant 0 : i32
    %c0_i32_1 = arith.constant 0 : i32
    return %arg0, %c0_i32, %arg1, %c0_i32_0 : i32, i32, i32, i32
  }
}

module attributes {stable_mosaic.version = 11 : i64} {
  func.func @post_attn_kernel(%arg0: i32, %arg1: memref<16x32xbf16, #tpu.memory_space<vmem>>, %arg2: memref<16x32xbf16, #tpu.memory_space<vmem>>, %arg3: memref<32x32xbf16, #tpu.memory_space<vmem>>, %arg4: memref<1x32xf32, #tpu.memory_space<vmem>>, %arg5: memref<1x32xf32, #tpu.memory_space<vmem>>, %arg6: memref<1x32xf32, #tpu.memory_space<vmem>>, %arg7: memref<32x64xbf16, #tpu.memory_space<vmem>>, %arg8: memref<1x64xf32, #tpu.memory_space<vmem>>, %arg9: memref<64x32xbf16, #tpu.memory_space<vmem>>, %arg10: memref<1x32xf32, #tpu.memory_space<vmem>>, %arg11: memref<1x32xf32, #tpu.memory_space<vmem>>, %arg12: memref<1x32xf32, #tpu.memory_space<vmem>>, %arg13: memref<16x32xbf16, #tpu.memory_space<vmem>>) attributes {dimension_semantics = [#tpu.dimension_semantics<parallel>], iteration_bounds = array<i64: 1>, scalar_prefetch = 0 : i64, scratch_operands = 0 : i64, tpu.core_type = #tpu.core_type<tc>, window_params = [{transform_indices = @transform_0, window_bounds = array<i64: 16, 32>}, {transform_indices = @transform_1, window_bounds = array<i64: 16, 32>}, {pipeline_mode = #tpu.pipeline_mode<synchronous>, transform_indices = @transform_2, window_bounds = array<i64: 32, 32>}, {pipeline_mode = #tpu.pipeline_mode<synchronous>, transform_indices = @transform_3, window_bounds = array<i64: 1, 32>}, {pipeline_mode = #tpu.pipeline_mode<synchronous>, transform_indices = @transform_4, window_bounds = array<i64: 1, 32>}, {pipeline_mode = #tpu.pipeline_mode<synchronous>, transform_indices = @transform_5, window_bounds = array<i64: 1, 32>}, {pipeline_mode = #tpu.pipeline_mode<synchronous>, transform_indices = @transform_6, window_bounds = array<i64: 32, 64>}, {pipeline_mode = #tpu.pipeline_mode<synchronous>, transform_indices = @transform_7, window_bounds = array<i64: 1, 64>}, {pipeline_mode = #tpu.pipeline_mode<synchronous>, transform_indices = @transform_8, window_bounds = array<i64: 64, 32>}, {pipeline_mode = #tpu.pipeline_mode<synchronous>, transform_indices = @transform_9, window_bounds = array<i64: 1, 32>}, {pipeline_mode = #tpu.pipeline_mode<synchronous>, transform_indices = @transform_10, window_bounds = array<i64: 1, 32>}, {pipeline_mode = #tpu.pipeline_mode<synchronous>, transform_indices = @transform_11, window_bounds = array<i64: 1, 32>}, {transform_indices = @transform_12, window_bounds = array<i64: 16, 32>}]} {
    %c0 = arith.constant 0 : index
    %c0_0 = arith.constant 0 : index
    %0 = vector.load %arg2[%c0, %c0_0] : memref<16x32xbf16, #tpu.memory_space<vmem>>, vector<16x32xbf16>
    %1 = arith.extf %0 : vector<16x32xbf16> to vector<16x32xf32>
    %c0_1 = arith.constant 0 : index
    %c0_2 = arith.constant 0 : index
    %2 = vector.load %arg1[%c0_1, %c0_2] : memref<16x32xbf16, #tpu.memory_space<vmem>>, vector<16x32xbf16>
    %c0_3 = arith.constant 0 : index
    %c0_4 = arith.constant 0 : index
    %3 = vector.load %arg3[%c0_3, %c0_4] : memref<32x32xbf16, #tpu.memory_space<vmem>>, vector<32x32xbf16>
    %cst = arith.constant dense<0.000000e+00> : vector<16x32xf32>
    %4 = tpu.matmul %2, %3, %cst {dimension_numbers = #tpu.dot_dimension_numbers<[1], [0], [0], [1], [0, 0, 1, 1], [], []>} : vector<16x32xbf16>, vector<32x32xbf16>, vector<16x32xf32> -> vector<16x32xf32>
    %c0_5 = arith.constant 0 : index
    %c0_6 = arith.constant 0 : index
    %5 = vector.load %arg4[%c0_5, %c0_6] : memref<1x32xf32, #tpu.memory_space<vmem>>, vector<1x32xf32>
    %6 = vector.broadcast %5 : vector<1x32xf32> to vector<16x32xf32>
    %7 = arith.addf %4, %6 : vector<16x32xf32>
    %8 = arith.addf %7, %1 : vector<16x32xf32>
    %c0_7 = arith.constant 0 : index
    %c0_8 = arith.constant 0 : index
    %9 = vector.load %arg5[%c0_7, %c0_8] : memref<1x32xf32, #tpu.memory_space<vmem>>, vector<1x32xf32>
    %c0_9 = arith.constant 0 : index
    %c0_10 = arith.constant 0 : index
    %10 = vector.load %arg6[%c0_9, %c0_10] : memref<1x32xf32, #tpu.memory_space<vmem>>, vector<1x32xf32>
    %cst_11 = arith.constant dense<0.000000e+00> : vector<16xf32>
    %11 = vector.multi_reduction <add>, %8, %cst_11 [1] : vector<16x32xf32> to vector<16xf32>
    %12 = vector.shape_cast %11 : vector<16xf32> to vector<16x1xf32>
    %cst_12 = arith.constant 3.200000e+01 : f32
    %13 = vector.broadcast %cst_12 : f32 to vector<16x1xf32>
    %14 = arith.divf %12, %13 : vector<16x1xf32>
    %15 = vector.broadcast %14 : vector<16x1xf32> to vector<16x32xf32>
    %16 = arith.subf %8, %15 : vector<16x32xf32>
    %17 = arith.mulf %16, %16 : vector<16x32xf32>
    %cst_13 = arith.constant dense<0.000000e+00> : vector<16xf32>
    %18 = vector.multi_reduction <add>, %17, %cst_13 [1] : vector<16x32xf32> to vector<16xf32>
    %19 = vector.shape_cast %18 : vector<16xf32> to vector<16x1xf32>
    %cst_14 = arith.constant 3.200000e+01 : f32
    %20 = vector.broadcast %cst_14 : f32 to vector<16x1xf32>
    %21 = arith.divf %19, %20 : vector<16x1xf32>
    %22 = vector.broadcast %14 : vector<16x1xf32> to vector<16x32xf32>
    %23 = arith.subf %8, %22 : vector<16x32xf32>
    %cst_15 = arith.constant 9.99999996E-13 : f32
    %24 = vector.broadcast %cst_15 : f32 to vector<16x1xf32>
    %25 = arith.addf %21, %24 : vector<16x1xf32>
    %26 = math.rsqrt %25 : vector<16x1xf32>
    %27 = vector.broadcast %26 : vector<16x1xf32> to vector<16x32xf32>
    %28 = arith.mulf %23, %27 : vector<16x32xf32>
    %29 = vector.broadcast %9 : vector<1x32xf32> to vector<16x32xf32>
    %30 = arith.mulf %28, %29 : vector<16x32xf32>
    %31 = vector.broadcast %10 : vector<1x32xf32> to vector<16x32xf32>
    %32 = arith.addf %30, %31 : vector<16x32xf32>
    %33 = arith.truncf %32 : vector<16x32xf32> to vector<16x32xbf16>
    %c0_16 = arith.constant 0 : index
    %c0_17 = arith.constant 0 : index
    %34 = vector.load %arg7[%c0_16, %c0_17] : memref<32x64xbf16, #tpu.memory_space<vmem>>, vector<32x64xbf16>
    %cst_18 = arith.constant dense<0.000000e+00> : vector<16x64xf32>
    %35 = tpu.matmul %33, %34, %cst_18 {dimension_numbers = #tpu.dot_dimension_numbers<[1], [0], [0], [1], [0, 0, 1, 1], [], []>} : vector<16x32xbf16>, vector<32x64xbf16>, vector<16x64xf32> -> vector<16x64xf32>
    %c0_19 = arith.constant 0 : index
    %c0_20 = arith.constant 0 : index
    %36 = vector.load %arg8[%c0_19, %c0_20] : memref<1x64xf32, #tpu.memory_space<vmem>>, vector<1x64xf32>
    %37 = vector.broadcast %36 : vector<1x64xf32> to vector<16x64xf32>
    %38 = arith.addf %35, %37 : vector<16x64xf32>
    %cst_21 = arith.constant 5.000000e-01 : f32
    %39 = vector.broadcast %cst_21 : f32 to vector<16x64xf32>
    %40 = arith.mulf %39, %38 : vector<16x64xf32>
    %41 = arith.mulf %38, %38 : vector<16x64xf32>
    %42 = arith.mulf %38, %41 : vector<16x64xf32>
    %cst_22 = arith.constant 4.471500e-02 : f32
    %43 = vector.broadcast %cst_22 : f32 to vector<16x64xf32>
    %44 = arith.mulf %43, %42 : vector<16x64xf32>
    %45 = arith.addf %38, %44 : vector<16x64xf32>
    %cst_23 = arith.constant 0.797884583 : f32
    %46 = vector.broadcast %cst_23 : f32 to vector<16x64xf32>
    %47 = arith.mulf %46, %45 : vector<16x64xf32>
    %48 = math.tanh %47 : vector<16x64xf32>
    %cst_24 = arith.constant 1.000000e+00 : f32
    %49 = vector.broadcast %cst_24 : f32 to vector<16x64xf32>
    %50 = arith.addf %49, %48 : vector<16x64xf32>
    %51 = arith.mulf %40, %50 : vector<16x64xf32>
    %52 = arith.truncf %51 : vector<16x64xf32> to vector<16x64xbf16>
    %c0_25 = arith.constant 0 : index
    %c0_26 = arith.constant 0 : index
    %53 = vector.load %arg9[%c0_25, %c0_26] : memref<64x32xbf16, #tpu.memory_space<vmem>>, vector<64x32xbf16>
    %cst_27 = arith.constant dense<0.000000e+00> : vector<16x32xf32>
    %54 = tpu.matmul %52, %53, %cst_27 {dimension_numbers = #tpu.dot_dimension_numbers<[1], [0], [0], [1], [0, 0, 1, 1], [], []>} : vector<16x64xbf16>, vector<64x32xbf16>, vector<16x32xf32> -> vector<16x32xf32>
    %c0_28 = arith.constant 0 : index
    %c0_29 = arith.constant 0 : index
    %55 = vector.load %arg10[%c0_28, %c0_29] : memref<1x32xf32, #tpu.memory_space<vmem>>, vector<1x32xf32>
    %56 = vector.broadcast %55 : vector<1x32xf32> to vector<16x32xf32>
    %57 = arith.addf %54, %56 : vector<16x32xf32>
    %58 = arith.addf %57, %32 : vector<16x32xf32>
    %c0_30 = arith.constant 0 : index
    %c0_31 = arith.constant 0 : index
    %59 = vector.load %arg11[%c0_30, %c0_31] : memref<1x32xf32, #tpu.memory_space<vmem>>, vector<1x32xf32>
    %c0_32 = arith.constant 0 : index
    %c0_33 = arith.constant 0 : index
    %60 = vector.load %arg12[%c0_32, %c0_33] : memref<1x32xf32, #tpu.memory_space<vmem>>, vector<1x32xf32>
    %cst_34 = arith.constant dense<0.000000e+00> : vector<16xf32>
    %61 = vector.multi_reduction <add>, %58, %cst_34 [1] : vector<16x32xf32> to vector<16xf32>
    %62 = vector.shape_cast %61 : vector<16xf32> to vector<16x1xf32>
    %cst_35 = arith.constant 3.200000e+01 : f32
    %63 = vector.broadcast %cst_35 : f32 to vector<16x1xf32>
    %64 = arith.divf %62, %63 : vector<16x1xf32>
    %65 = vector.broadcast %64 : vector<16x1xf32> to vector<16x32xf32>
    %66 = arith.subf %58, %65 : vector<16x32xf32>
    %67 = arith.mulf %66, %66 : vector<16x32xf32>
    %cst_36 = arith.constant dense<0.000000e+00> : vector<16xf32>
    %68 = vector.multi_reduction <add>, %67, %cst_36 [1] : vector<16x32xf32> to vector<16xf32>
    %69 = vector.shape_cast %68 : vector<16xf32> to vector<16x1xf32>
    %cst_37 = arith.constant 3.200000e+01 : f32
    %70 = vector.broadcast %cst_37 : f32 to vector<16x1xf32>
    %71 = arith.divf %69, %70 : vector<16x1xf32>
    %72 = vector.broadcast %64 : vector<16x1xf32> to vector<16x32xf32>
    %73 = arith.subf %58, %72 : vector<16x32xf32>
    %cst_38 = arith.constant 9.99999996E-13 : f32
    %74 = vector.broadcast %cst_38 : f32 to vector<16x1xf32>
    %75 = arith.addf %71, %74 : vector<16x1xf32>
    %76 = math.rsqrt %75 : vector<16x1xf32>
    %77 = vector.broadcast %76 : vector<16x1xf32> to vector<16x32xf32>
    %78 = arith.mulf %73, %77 : vector<16x32xf32>
    %79 = vector.broadcast %59 : vector<1x32xf32> to vector<16x32xf32>
    %80 = arith.mulf %78, %79 : vector<16x32xf32>
    %81 = vector.broadcast %60 : vector<1x32xf32> to vector<16x32xf32>
    %82 = arith.addf %80, %81 : vector<16x32xf32>
    %83 = arith.truncf %82 : vector<16x32xf32> to vector<16x32xbf16>
    %c0_39 = arith.constant 0 : index
    %c0_40 = arith.constant 0 : index
    %84 = vector.load %arg13[%c0_39, %c0_40] : memref<16x32xbf16, #tpu.memory_space<vmem>>, vector<16x32xbf16>
    tpu.vector_store %arg13[%c0_39, %c0_40], %83 {strides = array<i32>} : memref<16x32xbf16, #tpu.memory_space<vmem>>, vector<16x32xbf16>,
    return
  }
  func.func @transform_0(%arg0: i32) -> (i32, i32) {
    %c0_i32 = arith.constant 0 : i32
    %c0_i32_0 = arith.constant 0 : i32
    return %arg0, %c0_i32 : i32, i32
  }
  func.func @transform_1(%arg0: i32) -> (i32, i32) {
    %c0_i32 = arith.constant 0 : i32
    %c0_i32_0 = arith.constant 0 : i32
    return %arg0, %c0_i32 : i32, i32
  }
  func.func @transform_2(%arg0: i32) -> (i32, i32) {
    %c0_i32 = arith.constant 0 : i32
    %c0_i32_0 = arith.constant 0 : i32
    %c0_i32_1 = arith.constant 0 : i32
    return %c0_i32, %c0_i32_0 : i32, i32
  }
  func.func @transform_3(%arg0: i32) -> (i32, i32) {
    %c0_i32 = arith.constant 0 : i32
    %c0_i32_0 = arith.constant 0 : i32
    %c0_i32_1 = arith.constant 0 : i32
    return %c0_i32, %c0_i32_0 : i32, i32
  }
  func.func @transform_4(%arg0: i32) -> (i32, i32) {
    %c0_i32 = arith.constant 0 : i32
    %c0_i32_0 = arith.constant 0 : i32
    %c0_i32_1 = arith.constant 0 : i32
    return %c0_i32, %c0_i32_0 : i32, i32
  }
  func.func @transform_5(%arg0: i32) -> (i32, i32) {
    %c0_i32 = arith.constant 0 : i32
    %c0_i32_0 = arith.constant 0 : i32
    %c0_i32_1 = arith.constant 0 : i32
    return %c0_i32, %c0_i32_0 : i32, i32
  }
  func.func @transform_6(%arg0: i32) -> (i32, i32) {
    %c0_i32 = arith.constant 0 : i32
    %c0_i32_0 = arith.constant 0 : i32
    %c0_i32_1 = arith.constant 0 : i32
    return %c0_i32, %c0_i32_0 : i32, i32
  }
  func.func @transform_7(%arg0: i32) -> (i32, i32) {
    %c0_i32 = arith.constant 0 : i32
    %c0_i32_0 = arith.constant 0 : i32
    %c0_i32_1 = arith.constant 0 : i32
    return %c0_i32, %c0_i32_0 : i32, i32
  }
  func.func @transform_8(%arg0: i32) -> (i32, i32) {
    %c0_i32 = arith.constant 0 : i32
    %c0_i32_0 = arith.constant 0 : i32
    %c0_i32_1 = arith.constant 0 : i32
    return %c0_i32, %c0_i32_0 : i32, i32
  }
  func.func @transform_9(%arg0: i32) -> (i32, i32) {
    %c0_i32 = arith.constant 0 : i32
    %c0_i32_0 = arith.constant 0 : i32
    %c0_i32_1 = arith.constant 0 : i32
    return %c0_i32, %c0_i32_0 : i32, i32
  }
  func.func @transform_10(%arg0: i32) -> (i32, i32) {
    %c0_i32 = arith.constant 0 : i32
    %c0_i32_0 = arith.constant 0 : i32
    %c0_i32_1 = arith.constant 0 : i32
    return %c0_i32, %c0_i32_0 : i32, i32
  }
  func.func @transform_11(%arg0: i32) -> (i32, i32) {
    %c0_i32 = arith.constant 0 : i32
    %c0_i32_0 = arith.constant 0 : i32
    %c0_i32_1 = arith.constant 0 : i32
    return %c0_i32, %c0_i32_0 : i32, i32
  }
  func.func @transform_12(%arg0: i32) -> (i32, i32) {
    %c0_i32 = arith.constant 0 : i32
    %c0_i32_0 = arith.constant 0 : i32
    return %arg0, %c0_i32 : i32, i32
  }
}

</mosaic_0001>

<bundles_post_ra>
// kernel: etri_kobert_forward.8
= control target key start
LH: loop header
LB: loop body
LE: loop exit
PB: predicated region body
PF: predicated region fallthrough
CT: control target
= control target key end

     0   :  { %v159_v0 = vmov 0.0   ;;  %vm160_vm0 = vmmov 0   ;;  %vm48_vm1 = vcmask 261120   ;;  %vm101_vm2 = vcmask 257024   ;;  %s162_s27 = smov 96   ;;  %s229_s1 = inlined_call_operand.vmem [shape: bf16[32,96], index: 1, kind: input, shape index: {}]   ;;  %s230_s0 = inlined_call_operand.vmem [shape: bf16[16,32], index: 0, kind: input, shape index: {}]   ;;  %s231_s2 = inlined_call_operand.vmem [shape: f32[1,96], index: 2, kind: input, shape index: {}]   ;;  %s232_s3 = inlined_call_operand.vmem [shape: bf16[16,32], index: 3, kind: output, shape index: {0}]   ;;  %s233_s5 = inlined_call_operand.vmem [shape: bf16[16,32], index: 5, kind: output, shape index: {2}]   ;;  %s234_s4 = inlined_call_operand.vmem [shape: bf16[16,32], index: 4, kind: output, shape index: {1}]  }
   0x1   :  { %144 = vmatprep.subr.bf16.mxu0 %v159_v0  ;;  %v156_v1 = vld [vmem:[%s229_s1] sm:$0xff]   ;;  %148 = vmatprep.mubr.msk.bf16.mxu0 %vm160_vm0, %v159_v0  ;;  %v157_v2 = vld [vmem:[%s229_s1 + $0x8] sm:$0xff]  }
   0x2   :  { %145 = vmatpush3.bf16.msra.mxu0 %v156_v1  ;;  %v158_v3 = vld [vmem:[%s230_s0] sm:$0xff]   ;;  %s161_s0 = smov 64  }
   0x3   :  { %146 = vmatprep.subr.bf16.mxu0 %v159_v0  ;;  %v132_v4 = vld [vmem:[%s231_s2] ss:$0 sm:$0xff] }
   0x6   :  { %147 = vmatpush3.bf16.msra.mxu0 %v157_v2 }
   0x9   :  { %149 = vmatmul.mubr.msk.bf16.vlgmr.msra.gmra.mrb[0].mxu0 %vm48_vm1, %v158_v3 }
  0xdc   :  { %v86_v5 = vpop.f32.mrb[0].mxu0 }
  0xdd   :  { %v87_v6 = vadd.f32 %v132_v4, %v86_v5  ;;  %v150_v7 = vpop.f32.mrb[1].mxu0 }
  0xde   :  { %v89_v8 = vpop.f32.mrb[2].mxu0 }
  0xdf   :  { %v139_v9 = vpack.c.bf16 %v87_v6, %v87_v6  ;;  %v90_v10 = vadd.f32 %v132_v4, %v89_v8  ;;  %v151_v11 = vpop.f32.mrb[3].mxu0 }
  0xe1   :  { %102 = vst.msk [vmem:[%s232_s3] sm:$0xf] %vm101_vm2, %v139_v9  ;;  %v140_v12 = vpack.c.bf16 %v90_v10, %v90_v10  ;;  %112 = vrot.lane.b32.xlu1 %v139_v9, %s161_s0  ;;  %104 = vrot.lane.b32.xlu0 %v139_v9, %s162_s27 }
  0xe3   :  { %103 = vst.msk [vmem:[%s232_s3 + $0x4] sm:$0xf] %vm101_vm2, %v140_v12 }
  0xe5   :  { %114 = vrot.lane.b32.xlu1 %v140_v12, %s161_s0  ;;  %106 = vrot.lane.b32.xlu0 %v140_v12, %s162_s27 }
 0x153   :  { %v113_v13 = vpop.permute.xlu1 %112  ;;  %v105_v14 = vpop.permute.xlu0 %104 }
 0x154   :  { %118 = vst.msk [vmem:[%s233_s5] sm:$0xf] %vm101_vm2, %v113_v13  ;;  %110 = vst.msk [vmem:[%s234_s4] sm:$0xf] %vm101_vm2, %v105_v14 }
 0x157   :  { %v115_v15 = vpop.permute.xlu1 %114  ;;  %v107_v16 = vpop.permute.xlu0 %106 }
 0x158   :  { %119 = vst.msk [vmem:[%s233_s5 + $0x4] sm:$0xf] %vm101_vm2, %v115_v15  ;;  %111 = vst.msk [vmem:[%s234_s4 + $0x4] sm:$0xf] %vm101_vm2, %v107_v16 }

// kernel: etri_kobert_forward.7
= control target key start
LH: loop header
LB: loop body
LE: loop exit
PB: predicated region body
PF: predicated region fallthrough
CT: control target
= control target key end

     0   :  { %s536_s18 = smov 0   ;;  %s538_s19 = smov 0   ;;  %s586_s0 = inlined_call_operand.vmem [shape: bf16[2,8,32], index: 0, kind: input, shape index: {}]   ;;  %s587_s1 = inlined_call_operand.vmem [shape: bf16[2,8,32], index: 1, kind: input, shape index: {}]   ;;  %s588_s2 = inlined_call_operand.vmem [shape: bf16[8,32], index: 2, kind: input, shape index: {}]   ;;  %s589_s3 = inlined_call_operand.vmem [shape: f32[1,32], index: 3, kind: input, shape index: {}]   ;;  %s590_s4 = inlined_call_operand.vmem [shape: f32[1,32], index: 4, kind: input, shape index: {}]   ;;  %s591_s5 = inlined_call_operand.vmem [shape: bf16[2,8,32], index: 5, kind: output, shape index: {}]  }
   0x1   :  { %s540_s20 = smov 0  }
   0x2 LB: > { %s27_s21 = sadd.s32 1, %s500_s19  ;;  %p448_p0 = scmp.ge.s32.totalorder %s504_s20, 1  ;;  %s504_s20 = sphi %s540_s20, %s15_s20   ;;  %s500_s19 = sphi %s538_s19, %s593_s19   ;;  %s496_s18 = sphi %s536_s18, %s592_s18  }
   0x3   : > { %p29_p1 = scmp.ge.s32.totalorder %s27_s21, 2  ;;  %p228_p2 = scmp.lt.s32.totalorder %s504_s20, 3 }
   0x5   : > { %s595_s21 = smov (%p29_p1, %s27_s21), 0  ;;  %p229_p3 = pnand %p448_p0, %p228_p2 }
   0x6   : > { %p271_p4 = scmp.lt.s32.totalorder (!%p229_p3), %s496_s18, 1  ;;  %v301_v0 = vld [vmem:[%s588_s2] sm:$0xf] (!%p229_p3)  ;;  %vm306_vm0 = vcmask (!%p229_p3), 261120   ;;  %vm336_vm1 = vcmask (!%p229_p3), 257024  }
   0x7   : > { %232 = sbr.rel (%p229_p3) target bundleno = 341 (0x155), region = 40  ;;  %v302_v5 = vunpack.c.l.bf16 (!%p229_p3), %v301_v0  ;;  %v452_v18 = vld [vmem:[%s589_s3] ss:$0 sm:$0xff] (!%p229_p3) }
   0x8   : > { %v453_v20 = vld [vmem:[%s590_s4] ss:$0 sm:$0xff] (!%p229_p3) }
   0xe   : > { %s597_s18 = smov (!%p271_p4, %s496_s18), 1 }
   0xf   : > { %s554_s22 = sshll.u32 %s597_s18, 2 }
  0x10   : > { %s277_s27 = scalar_lea.vmem %s586_s0, %s554_s22  ;;  %s284_s30 = scalar_lea.vmem %s587_s1, %s554_s22 }
  0x11   : > { %v296_v1 = vld [vmem:[%s277_s27] sm:$0xf]  ;;  %s295_s12 = scalar_lea.vmem %s591_s5, %s554_s22 }
  0x12   : > { %v298_v2 = vld [vmem:[%s284_s30] sm:$0xf]  ;;  %v297_v3 = vunpack.c.l.bf16 %v296_v1 }
  0x13   : > { %v299_v4 = vunpack.c.l.bf16 %v298_v2 }
  0x15   : > { %v300_v6 = vadd.f32 %v299_v4, %v297_v3 }
  0x17   : > { %v303_v7 = vadd.f32 %v302_v5, %v300_v6 }
  0x19   : > { %v307_v8 = vsel %vm306_vm0, %v303_v7, 0.0 }
  0x1a   : > { %308 = vadd.xlane.f32.xlu0 %v307_v8 }
  0xa7   : > { %v309_v9 = vpop.xlane.xlu0 %308 }
  0xa8   : > { %v311_v10 = vmul.f32 0.03125, %v309_v9 }
  0xaa   : > { %v312_v11 = vsub.f32 %v303_v7, %v311_v10 }
  0xac   : > { %v313_v12 = vmul.f32 %v312_v11, %v312_v11 }
  0xae   : > { %v314_v13 = vsel %vm306_vm0, %v313_v12, 0.0 }
  0xaf   : > { %315 = vadd.xlane.f32.xlu0 %v314_v13 }
 0x13c   : > { %v316_v14 = vpop.xlane.xlu0 %315 }
 0x13d   : > { %v317_v15 = vmul.f32 0.03125, %v316_v14 }
 0x13f   : > { %v318_v16 = vadd.f32 1e-12, %v317_v15 }
 0x141   : > { %480 = vrsqrt.f32 %v318_v16 }
 0x14b   : > { %v481_v17 = vpop.eup %480 }
 0x14c   : > { %v320_v19 = vmul.f32 %v481_v17, %v312_v11 }
 0x14e   : > { %v327_v21 = vmul.f32 %v452_v18, %v320_v19 }
 0x150   : > { %v334_v22 = vadd.f32 %v453_v20, %v327_v21 }
 0x152   : > { %v335_v23 = vpack.c.bf16 %v334_v22, %v334_v22 }
 0x154   : > { %337 = vst.msk [vmem:[%s295_s12] sm:$0xf] %vm336_vm1, %v335_v23 }
 0x155 PF: > { %s15_s20 = sadd.s32 1, %s504_s20   ;;  %s592_s18 = smov %s500_s19 }
 0x156   : > { %p12_p5 = scmp.ge.s32.totalorder %s15_s20, 4   ;;  %s593_s19 = smov %s595_s21 }
 0x158   :  { %14 = sbr.rel (!%p12_p5) target bundleno = 2 (0x2), region = 76 }

// kernel: etri_kobert_forward.9
= control target key start
LH: loop header
LB: loop body
LE: loop exit
PB: predicated region body
PF: predicated region fallthrough
CT: control target
= control target key end

     0   :  { %s1039_s15 = smov 0   ;;  %s1041_s16 = smov 0   ;;  %s1139_s0 = inlined_call_operand.vmem [shape: bf16[2,4,8,8], index: 0, kind: input, shape index: {}]   ;;  %s1140_s1 = inlined_call_operand.vmem [shape: bf16[2,4,8,8], index: 1, kind: input, shape index: {}]   ;;  %s1141_s2 = inlined_call_operand.vmem [shape: bf16[2,4,8,8], index: 2, kind: input, shape index: {}]   ;;  %s1142_s3 = inlined_call_operand.vmem [shape: f32[2,1,8], index: 3, kind: input, shape index: {}]   ;;  %s1143_s4 = inlined_call_operand.vmem [shape: bf16[2,4,8,8], index: 4, kind: output, shape index: {}]  }
   0x1   :  { %s1043_s17 = smov 0  }
   0x2 LB: > { %s26_s18 = sadd.s32 1, %s1006_s16  ;;  %p858_p0 = scmp.ge.s32.totalorder %s1010_s17, 1  ;;  %s1010_s17 = sphi %s1043_s17, %s14_s17   ;;  %s1006_s16 = sphi %s1041_s16, %s1145_s16   ;;  %s1002_s15 = sphi %s1039_s15, %s1144_s15  }
   0x3   : > { %p28_p1 = scmp.ge.s32.totalorder %s26_s18, 2  ;;  %p209_p2 = scmp.lt.s32.totalorder %s1010_s17, 3 }
   0x5   : > { %s1147_s18 = smov (%p28_p1, %s26_s18), 0  ;;  %p210_p3 = pnand %p858_p0, %p209_p2 }
   0x6   : > { %p254_p4 = scmp.lt.s32.totalorder (!%p210_p3), %s1002_s15, 1  ;;  %v1012_v0 = vmov (!%p210_p3), 0.0   ;;  %vm1013_vm0 = vmmov (!%p210_p3), 0   ;;  %vm296_vm1 = vcmask (!%p210_p3), 64512   ;;  %vm547_vm2 = vcmask (!%p210_p3), 1043456  }
   0x7   : > { %213 = sbr.rel (%p210_p3) target bundleno = 785 (0x311), region = 36  ;;  %898 = vmatprep.subr.bf16.mxu0 (!%p210_p3), %v1012_v0  ;;  %904 = vmatprep.subr.bf16.mxu1 (!%p210_p3), %v1012_v0  ;;  %vm733_vm3 = vcmask (!%p210_p3), 60416  }
   0x8   : > { %900 = vmatprep.mubr.msk.bf16.mxu0 (!%p210_p3), %vm1013_vm0, %v1012_v0  ;;  %906 = vmatprep.mubr.msk.bf16.mxu1 (!%p210_p3), %vm1013_vm0, %v1012_v0 }
   0xe   : > { %s1149_s15 = smov (!%p254_p4, %s1002_s15), 1 }
   0xf   : > { %s1066_s19 = sshll.u32 %s1149_s15, 4  ;;  %s274_s28 = scalar_lea.vmem %s1142_s3, %s1149_s15 }
  0x10   : > { %s266_s22 = scalar_lea.vmem %s1140_s1, %s1066_s19  ;;  %s261_s25 = scalar_lea.vmem %s1139_s0, %s1066_s19  ;;  %v871_v15 = vld [vmem:[%s274_s28] ss:$0 sm:$0xff] }
  0x11   : > { %v288_v1 = vld [vmem:[%s266_s22] sm:$0xf]  ;;  %v289_v2 = vld [vmem:[%s266_s22 + $0x4] sm:$0xf]  ;;  %v290_v5 = vld [vmem:[%s266_s22 + $0x8] sm:$0xf]  ;;  %s271_s5 = scalar_lea.vmem %s1141_s2, %s1066_s19  ;;  %s282_s8 = scalar_lea.vmem %s1143_s4, %s1066_s19 }
  0x12   : > { %v301_v3 = vsel %vm296_vm1, %v288_v1, 0  ;;  %v347_v4 = vsel %vm296_vm1, %v289_v2, 0  ;;  %v291_v6 = vld [vmem:[%s266_s22 + $0xc] sm:$0xf]  ;;  %v284_v7 = vld [vmem:[%s261_s25] sm:$0xf] }
  0x13   : > { %899 = vmatpush3.bf16.xpose.msra.mxu0 %v301_v3  ;;  %905 = vmatpush3.bf16.xpose.msra.mxu1 %v347_v4  ;;  %v285_v8 = vld [vmem:[%s261_s25 + $0x4] sm:$0xf]  ;;  %v393_v9 = vsel %vm296_vm1, %v290_v5, 0  ;;  %v439_v10 = vsel %vm296_vm1, %v291_v6, 0  ;;  %v286_v11 = vld [vmem:[%s261_s25 + $0x8] sm:$0xf] }
  0x14   : > { %910 = vmatprep.subr.bf16.mxu0 %v1012_v0  ;;  %916 = vmatprep.subr.bf16.mxu1 %v1012_v0  ;;  %v287_v12 = vld [vmem:[%s261_s25 + $0xc] sm:$0xf]  ;;  %v292_v62 = vld [vmem:[%s271_s5] sm:$0xf]  ;;  %v293_v1 = vld [vmem:[%s271_s5 + $0x4] sm:$0xf] }
  0x15   : > { %v549_v63 = vsel %vm547_vm2, %v292_v62, 0  ;;  %v595_v2 = vsel %vm547_vm2, %v293_v1, 0  ;;  %v294_v3 = vld [vmem:[%s271_s5 + $0x8] sm:$0xf]  ;;  %v295_v5 = vld [vmem:[%s271_s5 + $0xc] sm:$0xf] }
  0x16   : > { %v641_v4 = vsel %vm547_vm2, %v294_v3, 0  ;;  %v687_v6 = vsel %vm547_vm2, %v295_v5, 0 }
  0x1a   : > { %901 = vmatmul.mubr.msk.bf16.vlgmr.msra.gmra.mrb[0].mxu0 %vm296_vm1, %v284_v7  ;;  %907 = vmatmul.mubr.msk.bf16.vlgmr.msra.gmra.mrb[0].mxu1 %vm296_vm1, %v285_v8 }
  0x1b   : > { %911 = vmatpush3.bf16.xpose.msra.mxu0 %v393_v9  ;;  %917 = vmatpush3.bf16.xpose.msra.mxu1 %v439_v10 }
  0x1c   : > { %912 = vmatprep.mubr.msk.bf16.mxu0 %vm1013_vm0, %v1012_v0  ;;  %918 = vmatprep.mubr.msk.bf16.mxu1 %vm1013_vm0, %v1012_v0 }
  0x1d   : > { %922 = vmatprep.subr.bf16.mxu0 %v1012_v0  ;;  %928 = vmatprep.subr.bf16.mxu1 %v1012_v0 }
  0x22   : > { %913 = vmatmul.mubr.msk.bf16.vlgmr.msra.gmra.mrb[4].mxu0 %vm296_vm1, %v286_v11  ;;  %919 = vmatmul.mubr.msk.bf16.vlgmr.msra.gmra.mrb[4].mxu1 %vm296_vm1, %v287_v12 }
  0x23   : > { %924 = vmatprep.mubr.msk.bf16.mxu0 %vm1013_vm0, %v1012_v0  ;;  %930 = vmatprep.mubr.msk.bf16.mxu1 %vm1013_vm0, %v1012_v0 }
  0x24   : > { %923 = vmatpush3.bf16.msra.mxu0 %v549_v63  ;;  %929 = vmatpush3.bf16.msra.mxu1 %v595_v2 }
  0x25   : > { %934 = vmatprep.subr.bf16.mxu0 %v1012_v0  ;;  %940 = vmatprep.subr.bf16.mxu1 %v1012_v0 }
  0xed   : > { %v337_v13 = vpop.f32.mrb[0].mxu0  ;;  %v383_v14 = vpop.f32.mrb[0].mxu1 }
  0xee   : > { %v481_v16 = vmul.f32 0.35355338, %v337_v13  ;;  %v902_v17 = vpop.f32.mrb[1].mxu0  ;;  %v482_v18 = vmul.f32 0.35355338, %v383_v14  ;;  %v908_v19 = vpop.f32.mrb[1].mxu1 }
  0xef   : > { %v340_v20 = vpop.f32.mrb[2].mxu0  ;;  %v386_v21 = vpop.f32.mrb[2].mxu1 }
  0xf0   : > { %v903_v22 = vpop.f32.mrb[3].mxu0  ;;  %v909_v23 = vpop.f32.mrb[3].mxu1  ;;  %v492_v24 = vadd.f32 %v871_v15, %v481_v16  ;;  %v493_v25 = vadd.f32 %v871_v15, %v482_v18 }
  0xf2   : > { %v496_v26 = vsel %vm296_vm1, %v492_v24, -inf  ;;  %v499_v27 = vsel %vm296_vm1, %v493_v25, -inf }
  0xf3   : > { %497 = vmax.xlane.f32.xlu0 %v496_v26 }
  0xf5   : > { %v429_v28 = vpop.f32.mrb[4].mxu0  ;;  %v475_v29 = vpop.f32.mrb[4].mxu1 }
  0xf6   : > { %v483_v30 = vmul.f32 0.35355338, %v429_v28  ;;  %v914_v31 = vpop.f32.mrb[5].mxu0  ;;  %v484_v32 = vmul.f32 0.35355338, %v475_v29  ;;  %v920_v33 = vpop.f32.mrb[5].mxu1 }
  0xf7   : > { %500 = vmax.xlane.f32.xlu0 %v499_v27  ;;  %v432_v34 = vpop.f32.mrb[6].mxu0  ;;  %v478_v35 = vpop.f32.mrb[6].mxu1 }
  0xf8   : > { %v915_v36 = vpop.f32.mrb[7].mxu0  ;;  %v921_v37 = vpop.f32.mrb[7].mxu1  ;;  %v494_v38 = vadd.f32 %v871_v15, %v483_v30  ;;  %v495_v39 = vadd.f32 %v871_v15, %v484_v32 }
  0xfa   : > { %v502_v40 = vsel %vm296_vm1, %v494_v38, -inf  ;;  %v505_v41 = vsel %vm296_vm1, %v495_v39, -inf }
  0xfb   : > { %503 = vmax.xlane.f32.xlu1 %v502_v40 }
  0xff   : > { %506 = vmax.xlane.f32.xlu1 %v505_v41 }
 0x180   : > { %v498_v42 = vpop.xlane.xlu0 %497 }
 0x181   : > { %v508_v43 = vsub.f32 %v492_v24, %v498_v42 }
 0x183   : > { %v512_v44 = vmul.f32 1.442695, %v508_v43 }
 0x184   : > { %v501_v45 = vpop.xlane.xlu0 %500 }
 0x185   : > { %972 = vpow2.f32 %v512_v44  ;;  %v509_v46 = vsub.f32 %v493_v25, %v501_v45 }
 0x187   : > { %v514_v47 = vmul.f32 1.442695, %v509_v46 }
 0x188   : > { %v504_v48 = vpop.xlane.xlu1 %503 }
 0x189   : > { %974 = vpow2.f32 %v514_v47  ;;  %v510_v49 = vsub.f32 %v494_v38, %v504_v48 }
 0x18b   : > { %v516_v50 = vmul.f32 1.442695, %v510_v49 }
 0x18c   : > { %v507_v51 = vpop.xlane.xlu1 %506 }
 0x18d   : > { %976 = vpow2.f32 %v516_v50  ;;  %v511_v52 = vsub.f32 %v495_v39, %v507_v51 }
 0x18f   : > { %v973_v53 = vpop.eup %972  ;;  %v518_v54 = vmul.f32 1.442695, %v511_v52 }
 0x190   : > { %v520_v55 = vsel %vm296_vm1, %v973_v53, 0.0 }
 0x191   : > { %978 = vpow2.f32 %v518_v54  ;;  %521 = vadd.xlane.f32.xlu0 %v520_v55 }
 0x193   : > { %v975_v56 = vpop.eup %974 }
 0x194   : > { %v523_v57 = vsel %vm296_vm1, %v975_v56, 0.0 }
 0x195   : > { %524 = vadd.xlane.f32.xlu1 %v523_v57 }
 0x197   : > { %v977_v58 = vpop.eup %976 }
 0x198   : > { %v526_v59 = vsel %vm296_vm1, %v977_v58, 0.0 }
 0x199   : > { %527 = vadd.xlane.f32.xlu0 %v526_v59 }
 0x19b   : > { %v979_v60 = vpop.eup %978 }
 0x19c   : > { %v529_v61 = vsel %vm296_vm1, %v979_v60, 0.0 }
 0x19d   : > { %530 = vadd.xlane.f32.xlu1 %v529_v61 }
 0x21e   : > { %v522_v7 = vpop.xlane.xlu0 %521 }
 0x21f   : > { %980 = vrcp.f32 %v522_v7 }
 0x222   : > { %v525_v8 = vpop.xlane.xlu1 %524 }
 0x223   : > { %982 = vrcp.f32 %v525_v8 }
 0x226   : > { %v528_v9 = vpop.xlane.xlu0 %527 }
 0x227   : > { %984 = vrcp.f32 %v528_v9 }
 0x229   : > { %v981_v10 = vpop.eup %980 }
 0x22a   : > { %v536_v11 = vmul.f32 %v981_v10, %v973_v53  ;;  %v531_v12 = vpop.xlane.xlu1 %530 }
 0x22b   : > { %986 = vrcp.f32 %v531_v12 }
 0x22c   : > { %v540_v13 = vpack.c.bf16 %v536_v11, %v536_v11 }
 0x22d   : > { %v983_v14 = vpop.eup %982 }
 0x22e   : > { %v537_v15 = vmul.f32 %v983_v14, %v975_v56  ;;  %925 = vmatmul.mubr.msk.bf16.vlgmr.msra.gmra.mrb[8].mxu0 %vm296_vm1, %v540_v13 }
 0x22f   : > { %935 = vmatpush3.bf16.msra.mxu0 %v641_v4  ;;  %936 = vmatprep.mubr.msk.bf16.mxu0 %vm1013_vm0, %v1012_v0 }
 0x230   : > { %v541_v16 = vpack.c.bf16 %v537_v15, %v537_v15 }
 0x231   : > { %v985_v17 = vpop.eup %984 }
 0x232   : > { %v538_v18 = vmul.f32 %v985_v17, %v977_v58  ;;  %931 = vmatmul.mubr.msk.bf16.vlgmr.msra.gmra.mrb[8].mxu1 %vm296_vm1, %v541_v16 }
 0x233   : > { %941 = vmatpush3.bf16.msra.mxu1 %v687_v6  ;;  %942 = vmatprep.mubr.msk.bf16.mxu1 %vm1013_vm0, %v1012_v0 }
 0x234   : > { %v542_v19 = vpack.c.bf16 %v538_v18, %v538_v18 }
 0x235   : > { %v987_v20 = vpop.eup %986 }
 0x236   : > { %v539_v21 = vmul.f32 %v987_v20, %v979_v60  ;;  %937 = vmatmul.mubr.msk.bf16.vlgmr.msra.gmra.mrb[12].mxu0 %vm296_vm1, %v542_v19 }
 0x238   : > { %v543_v22 = vpack.c.bf16 %v539_v21, %v539_v21 }
 0x23a   : > { %943 = vmatmul.mubr.msk.bf16.vlgmr.msra.gmra.mrb[12].mxu1 %vm296_vm1, %v543_v22 }
 0x301   : > { %v585_v23 = vpop.f32.mrb[8].mxu0 }
 0x302   : > { %v729_v24 = vpack.c.bf16 %v585_v23, %v585_v23  ;;  %v926_v25 = vpop.f32.mrb[9].mxu0 }
 0x303   : > { %v588_v26 = vpop.f32.mrb[10].mxu0 }
 0x304   : > { %734 = vst.msk [vmem:[%s282_s8] sm:$0xf] %vm733_vm3, %v729_v24  ;;  %v927_v0 = vpop.f32.mrb[11].mxu0 }
 0x305   : > { %v631_v27 = vpop.f32.mrb[8].mxu1 }
 0x306   : > { %v730_v28 = vpack.c.bf16 %v631_v27, %v631_v27  ;;  %v932_v29 = vpop.f32.mrb[9].mxu1 }
 0x307   : > { %v634_v30 = vpop.f32.mrb[10].mxu1 }
 0x308   : > { %735 = vst.msk [vmem:[%s282_s8 + $0x4] sm:$0xf] %vm733_vm3, %v730_v28  ;;  %v933_v31 = vpop.f32.mrb[11].mxu1 }
 0x309   : > { %v677_v32 = vpop.f32.mrb[12].mxu0 }
 0x30a   : > { %v731_v33 = vpack.c.bf16 %v677_v32, %v677_v32  ;;  %v938_v34 = vpop.f32.mrb[13].mxu0 }
 0x30b   : > { %v680_v35 = vpop.f32.mrb[14].mxu0 }
 0x30c   : > { %736 = vst.msk [vmem:[%s282_s8 + $0x8] sm:$0xf] %vm733_vm3, %v731_v33  ;;  %v939_v36 = vpop.f32.mrb[15].mxu0 }
 0x30d   : > { %v723_v37 = vpop.f32.mrb[12].mxu1 }
 0x30e   : > { %v732_v38 = vpack.c.bf16 %v723_v37, %v723_v37  ;;  %v944_v39 = vpop.f32.mrb[13].mxu1 }
 0x30f   : > { %v726_v40 = vpop.f32.mrb[14].mxu1 }
 0x310   : > { %737 = vst.msk [vmem:[%s282_s8 + $0xc] sm:$0xf] %vm733_vm3, %v732_v38  ;;  %v945_v41 = vpop.f32.mrb[15].mxu1 }
 0x311 PF: > { %s14_s17 = sadd.s32 1, %s1010_s17   ;;  %s1144_s15 = smov %s1006_s16 }
 0x312   : > { %p11_p5 = scmp.ge.s32.totalorder %s14_s17, 4   ;;  %s1145_s16 = smov %s1147_s18 }
 0x314   :  { %13 = sbr.rel (!%p11_p5) target bundleno = 2 (0x2), region = 75 }

// kernel: etri_kobert_forward.10
= control target key start
LH: loop header
LB: loop body
LE: loop exit
PB: predicated region body
PF: predicated region fallthrough
CT: control target
= control target key end

     0   :  { %v489_v0 = vmov 0.0   ;;  %vm490_vm0 = vmmov 0   ;;  %vm76_vm1 = vcmask 261120   ;;  %vm294_vm2 = vcmask 523264   ;;  %s634_s2 = inlined_call_operand.vmem [shape: bf16[32,32], index: 2, kind: input, shape index: {}]   ;;  %s635_s0 = inlined_call_operand.vmem [shape: bf16[16,32], index: 0, kind: input, shape index: {}]   ;;  %s636_s1 = inlined_call_operand.vmem [shape: bf16[16,32], index: 1, kind: input, shape index: {}, may-alias: {1,12}]   ;;  %s637_s3 = inlined_call_operand.vmem [shape: f32[1,32], index: 3, kind: input, shape index: {}]   ;;  %s638_s6 = inlined_call_operand.vmem [shape: bf16[32,64], index: 6, kind: input, shape index: {}]   ;;  %s639_s4 = inlined_call_operand.vmem [shape: f32[1,32], index: 4, kind: input, shape index: {}]   ;;  %s640_s5 = inlined_call_operand.vmem [shape: f32[1,32], index: 5, kind: input, shape index: {}]   ;;  %s641_s8 = inlined_call_operand.vmem [shape: bf16[64,32], index: 8, kind: input, shape index: {}]   ;;  %s642_s7 = inlined_call_operand.vmem [shape: f32[1,64], index: 7, kind: input, shape index: {}]   ;;  %s643_s9 = inlined_call_operand.vmem [shape: f32[1,32], index: 9, kind: input, shape index: {}]   ;;  %s644_s10 = inlined_call_operand.vmem [shape: f32[1,32], index: 10, kind: input, shape index: {}]   ;;  %s645_s11 = inlined_call_operand.vmem [shape: f32[1,32], index: 11, kind: input, shape index: {}]   ;;  %s646_s12 = inlined_call_operand.vmem [shape: bf16[16,32], index: 12, kind: output, shape index: {}, may-alias: {1,12}]  }
   0x1   :  { %438 = vmatprep.subr.bf16.mxu1 %v489_v0  ;;  %v468_v1 = vld [vmem:[%s634_s2] sm:$0xff]   ;;  %442 = vmatprep.mubr.msk.bf16.mxu1 %vm490_vm0, %v489_v0  ;;  %v469_v2 = vld [vmem:[%s634_s2 + $0x8] sm:$0xff]   ;;  %v475_v49 = vld [vmem:[%s641_s8 + $0x10] sm:$0xff]   ;;  %vm393_vm3 = vcmask 257024  }
   0x2   :  { %454 = vmatprep.subr.bf16.mxu0 %v489_v0  ;;  %462 = vmatprep.mubr.msk.bf16.mxu0 %vm490_vm0, %v489_v0  ;;  %v470_v3 = vld [vmem:[%s635_s0] sm:$0xff]   ;;  %v472_v29 = vld [vmem:[%s638_s6 + $0x8] sm:$0xff]   ;;  %v476_v50 = vld [vmem:[%s641_s8 + $0x18] sm:$0xff]  }
   0x3   :  { %439 = vmatpush3.bf16.msra.mxu1 %v468_v1  ;;  %v424_v4 = vld [vmem:[%s636_s1] sm:$0xff]   ;;  %v474_v48 = vld [vmem:[%s641_s8 + $0x8] sm:$0xff]  }
   0x4   :  { %440 = vmatprep.subr.bf16.mxu1 %v489_v0  ;;  %v400_v5 = vld [vmem:[%s637_s3] ss:$0 sm:$0xff]  ;;  %v425_v6 = vunpack.c.l.bf16 %v424_v4  ;;  %v426_v10 = vunpack.c.h.bf16 %v424_v4 }
   0x5   :  { %v471_v28 = vld [vmem:[%s638_s6] sm:$0xff]  }
   0x6   :  { %v405_v38 = vld [vmem:[%s639_s4] ss:$0 sm:$0xff] }
   0x7   :  { %441 = vmatpush3.bf16.msra.mxu1 %v469_v2  ;;  %v406_v42 = vld [vmem:[%s640_s5] ss:$0 sm:$0xff] }
   0x8   :  { %446 = vmatprep.subr.bf16.mxu1 %v489_v0  ;;  %v473_v47 = vld [vmem:[%s641_s8] sm:$0xff]  }
   0x9   :  { %455 = vmatpush3.bf16.msra.mxu0 %v473_v47  ;;  %v407_v51 = vld [vmem:[%s642_s7] ss:$0 sm:$0xff] }
   0xa   :  { %443 = vmatmul.mubr.msk.bf16.vlgmr.msra.gmra.mrb[0].mxu1 %vm76_vm1, %v470_v3  ;;  %456 = vmatprep.subr.bf16.mxu0 %v489_v0 }
   0xb   :  { %450 = vmatprep.mubr.msk.bf16.mxu1 %vm490_vm0, %v489_v0  ;;  %447 = vmatpush3.bf16.msra.mxu1 %v471_v28 }
   0xc   :  { %448 = vmatprep.subr.bf16.mxu1 %v489_v0 }
   0xd   :  { %457 = vmatpush3.bf16.msra.mxu0 %v474_v48 }
   0xe   :  { %458 = vmatprep.subr.bf16.mxu0 %v489_v0 }
   0xf   :  { %449 = vmatpush3.bf16.msra.mxu1 %v472_v29 }
  0x11   :  { %459 = vmatpush3.bf16.msra.mxu0 %v475_v49 }
  0x12   :  { %460 = vmatprep.subr.bf16.mxu0 %v489_v0 }
  0x15   :  { %461 = vmatpush3.bf16.msra.mxu0 %v476_v50 }
  0xdd   :  { %v114_v7 = vpop.f32.mrb[0].mxu1 }
  0xde   :  { %v115_v8 = vadd.f32 %v400_v5, %v114_v7  ;;  %v444_v9 = vpop.f32.mrb[1].mxu1 }
  0xdf   :  { %v117_v11 = vpop.f32.mrb[2].mxu1 }
  0xe0   :  { %v118_v12 = vadd.f32 %v400_v5, %v117_v11  ;;  %v445_v13 = vpop.f32.mrb[3].mxu1  ;;  %v121_v14 = vadd.f32 %v425_v6, %v115_v8 }
  0xe1   :  { %v411_v13 = vld [vmem:[%s643_s9] ss:$0 sm:$0xff] }
  0xe2   :  { %v125_v15 = vsel %vm76_vm1, %v121_v14, 0.0  ;;  %v122_v16 = vadd.f32 %v426_v10, %v118_v12 }
  0xe3   :  { %126 = vadd.xlane.f32.xlu0 %v125_v15 }
  0xe4   :  { %v128_v17 = vsel %vm76_vm1, %v122_v16, 0.0 }
  0xe7   :  { %129 = vadd.xlane.f32.xlu0 %v128_v17 }
 0x170   :  { %v127_v18 = vpop.xlane.xlu0 %126 }
 0x171   :  { %v132_v19 = vmul.f32 0.03125, %v127_v18 }
 0x173   :  { %v134_v20 = vsub.f32 %v121_v14, %v132_v19 }
 0x174   :  { %v130_v21 = vpop.xlane.xlu0 %129 }
 0x175   :  { %v133_v22 = vmul.f32 0.03125, %v130_v21  ;;  %v136_v23 = vmul.f32 %v134_v20, %v134_v20 }
 0x177   :  { %v135_v24 = vsub.f32 %v122_v16, %v133_v22  ;;  %v138_v25 = vsel %vm76_vm1, %v136_v23, 0.0 }
 0x178   :  { %139 = vadd.xlane.f32.xlu1 %v138_v25 }
 0x179   :  { %v137_v26 = vmul.f32 %v135_v24, %v135_v24 }
 0x17b   :  { %v141_v27 = vsel %vm76_vm1, %v137_v26, 0.0 }
 0x17c   :  { %142 = vadd.xlane.f32.xlu1 %v141_v27 }
 0x205   :  { %v140_v30 = vpop.xlane.xlu1 %139 }
 0x206   :  { %v144_v31 = vmul.f32 0.03125, %v140_v30 }
 0x208   :  { %v146_v32 = vadd.f32 1e-12, %v144_v31 }
 0x209   :  { %v143_v33 = vpop.xlane.xlu1 %142 }
 0x20a   :  { %477 = vrsqrt.f32 %v146_v32  ;;  %v145_v34 = vmul.f32 0.03125, %v143_v33 }
 0x20c   :  { %v147_v35 = vadd.f32 1e-12, %v145_v34 }
 0x20e   :  { %479 = vrsqrt.f32 %v147_v35 }
 0x214   :  { %v478_v36 = vpop.eup %477 }
 0x215   :  { %v150_v37 = vmul.f32 %v478_v36, %v134_v20 }
 0x217   :  { %v158_v40 = vmul.f32 %v405_v38, %v150_v37 }
 0x218   :  { %v480_v39 = vpop.eup %479 }
 0x219   :  { %v151_v41 = vmul.f32 %v480_v39, %v135_v24  ;;  %v166_v44 = vadd.f32 %v406_v42, %v158_v40 }
 0x21b   :  { %v159_v43 = vmul.f32 %v405_v38, %v151_v41  ;;  %v417_v41 = vld [vmem:[%s644_s10] ss:$0 sm:$0xff] }
 0x21d   :  { %v167_v45 = vadd.f32 %v406_v42, %v159_v43 }
 0x21f   :  { %v168_v46 = vpack.c.bf16 %v167_v45, %v166_v44 }
 0x221   :  { %451 = vmatmul.mubr.msk.bf16.vlgmr.msra.gmra.mrb[4].mxu1 %vm76_vm1, %v168_v46 }
 0x2f4   :  { %v229_v52 = vpop.f32.mrb[4].mxu1 }
 0x2f5   :  { %v230_v53 = vadd.f32 %v407_v51, %v229_v52  ;;  %v452_v54 = vpop.f32.mrb[5].mxu1 }
 0x2f6   :  { %v232_v55 = vpop.f32.mrb[6].mxu1 }
 0x2f7   :  { %v238_v56 = vmul.f32 %v230_v53, %v230_v53  ;;  %v233_v57 = vadd.f32 %v407_v51, %v232_v55  ;;  %v453_v58 = vpop.f32.mrb[7].mxu1  ;;  %v236_v7 = vmul.f32 0.5, %v230_v53 }
 0x2f9   :  { %v240_v59 = vmul.f32 %v238_v56, %v230_v53  ;;  %v239_v60 = vmul.f32 %v233_v57, %v233_v57  ;;  %v237_v8 = vmul.f32 0.5, %v233_v57 }
 0x2fb   :  { %v242_v61 = vmul.f32 0.044715, %v240_v59  ;;  %v241_v62 = vmul.f32 %v239_v60, %v233_v57 }
 0x2fd   :  { %v244_v63 = vadd.f32 %v242_v61, %v230_v53  ;;  %v243_v1 = vmul.f32 0.044715, %v241_v62 }
 0x2ff   :  { %v246_v2 = vmul.f32 0.7978846, %v244_v63  ;;  %v245_v0 = vadd.f32 %v243_v1, %v233_v57 }
 0x301   :  { %481 = vtanh.f32 %v246_v2  ;;  %v247_v3 = vmul.f32 0.7978846, %v245_v0 }
 0x303   :  { %483 = vtanh.f32 %v247_v3 }
 0x30b   :  { %v482_v4 = vpop.eup %481 }
 0x30c   :  { %v250_v5 = vadd.f32 1.0, %v482_v4 }
 0x30d   :  { %v484_v6 = vpop.eup %483 }
 0x30e   :  { %v251_v9 = vadd.f32 1.0, %v484_v6  ;;  %v252_v10 = vmul.f32 %v250_v5, %v236_v7 }
 0x310   :  { %v253_v11 = vmul.f32 %v251_v9, %v237_v8 }
 0x312   :  { %v254_v12 = vpack.c.bf16 %v253_v11, %v252_v10 }
 0x314   :  { %463 = vmatmul.mubr.msk.bf16.vlgmr.msra.gmra.mrb[0].mxu0 %vm294_vm2, %v254_v12 }
 0x3e7   :  { %v332_v14 = vpop.f32.mrb[0].mxu0 }
 0x3e8   :  { %v333_v15 = vadd.f32 %v411_v13, %v332_v14  ;;  %v464_v16 = vpop.f32.mrb[1].mxu0 }
 0x3e9   :  { %v335_v17 = vpop.f32.mrb[2].mxu0 }
 0x3ea   :  { %v336_v18 = vadd.f32 %v411_v13, %v335_v17  ;;  %v465_v19 = vpop.f32.mrb[3].mxu0  ;;  %v339_v20 = vadd.f32 %v333_v15, %v166_v44  ;;  %v418_v44 = vld [vmem:[%s645_s11] ss:$0 sm:$0xff] }
 0x3ec   :  { %v343_v21 = vsel %vm76_vm1, %v339_v20, 0.0  ;;  %v340_v22 = vadd.f32 %v336_v18, %v167_v45 }
 0x3ed   :  { %344 = vadd.xlane.f32.xlu0 %v343_v21 }
 0x3ee   :  { %v346_v23 = vsel %vm76_vm1, %v340_v22, 0.0 }
 0x3ef   :  { %347 = vadd.xlane.f32.xlu1 %v346_v23 }
 0x47a   :  { %v345_v24 = vpop.xlane.xlu0 %344 }
 0x47b   :  { %v349_v25 = vmul.f32 0.03125, %v345_v24 }
 0x47c   :  { %v348_v26 = vpop.xlane.xlu1 %347 }
 0x47d   :  { %v351_v27 = vsub.f32 %v339_v20, %v349_v25  ;;  %v350_v28 = vmul.f32 0.03125, %v348_v26 }
 0x47f   :  { %v352_v29 = vsub.f32 %v340_v22, %v350_v28  ;;  %v353_v30 = vmul.f32 %v351_v27, %v351_v27 }
 0x481   :  { %v355_v31 = vsel %vm76_vm1, %v353_v30, 0.0  ;;  %v354_v32 = vmul.f32 %v352_v29, %v352_v29 }
 0x482   :  { %356 = vadd.xlane.f32.xlu0 %v355_v31 }
 0x483   :  { %v358_v33 = vsel %vm76_vm1, %v354_v32, 0.0 }
 0x484   :  { %359 = vadd.xlane.f32.xlu1 %v358_v33 }
 0x50f   :  { %v357_v34 = vpop.xlane.xlu0 %356 }
 0x510   :  { %v361_v35 = vmul.f32 0.03125, %v357_v34 }
 0x511   :  { %v360_v36 = vpop.xlane.xlu1 %359 }
 0x512   :  { %v363_v37 = vadd.f32 1e-12, %v361_v35  ;;  %v362_v38 = vmul.f32 0.03125, %v360_v36 }
 0x514   :  { %485 = vrsqrt.f32 %v363_v37  ;;  %v364_v39 = vadd.f32 1e-12, %v362_v38 }
 0x516   :  { %487 = vrsqrt.f32 %v364_v39 }
 0x51e   :  { %v486_v40 = vpop.eup %485 }
 0x51f   :  { %v367_v42 = vmul.f32 %v486_v40, %v351_v27 }
 0x520   :  { %v488_v43 = vpop.eup %487 }
 0x521   :  { %v375_v45 = vmul.f32 %v417_v41, %v367_v42  ;;  %v368_v46 = vmul.f32 %v488_v43, %v352_v29 }
 0x523   :  { %v383_v47 = vadd.f32 %v418_v44, %v375_v45  ;;  %v376_v48 = vmul.f32 %v417_v41, %v368_v46 }
 0x525   :  { %v421_v49 = vpack.c.bf16 %v383_v47, %v383_v47  ;;  %v384_v50 = vadd.f32 %v418_v44, %v376_v48 }
 0x527   :  { %394 = vst.msk [vmem:[%s646_s12] sm:$0xf] %vm393_vm3, %v421_v49  ;;  %v422_v51 = vpack.c.bf16 %v384_v50, %v384_v50 }
 0x529   :  { %395 = vst.msk [vmem:[%s646_s12 + $0x4] sm:$0xf] %vm393_vm3, %v422_v51 }

</bundles_post_ra>
